<compile_context>
chip_gen: v6e
topology: v6e:2x2x1
jax: 0.10.0
libtpu: 0.0.40
codegen_flags: <defaults>
</compile_context>

<pallas_src>
import functools

import jax
import jax.numpy as jnp
import numpy as np
from jax.experimental import pallas as pl
from jax.experimental.pallas import tpu as pltpu


def _round_up(x: int, m: int) -> int:
    return (x + m - 1) // m * m


def _gather_pad_kernel(off_ref, len_ref, packed_hbm, out_ref, sem, *,
                       t_pad, t_sub, group):
    """Assemble `group` sentences per grid step.

    off_ref / len_ref : SMEM scalar-prefetch refs (per-sentence start row and
                        token count inside the packed ragged buffer).
    packed_hbm        : [total_tokens + t_pad, E_pad] ragged concat with a
                        zero tail so the fixed-size DMA window never reads OOB.
    out_ref           : (group, t_pad, E_pad) output tile for this grid step.
    """
    step = pl.program_id(0)

    # ---- Phase 0: hoist every SMEM scalar read above the first DMA wait ----
    offs = [off_ref[step * group + g] for g in range(group)]
    lens = [len_ref[step * group + g] for g in range(group)]

    # ---- Phase 1: launch all gathers so their DMA latencies overlap --------
    copies = []
    for g in range(group):                                 # static unroll
        cp = pltpu.make_async_copy(
            packed_hbm.at[pl.ds(offs[g], t_pad), :],
            out_ref.at[g],
            sem.at[g])
        cp.start()
        copies.append(cp)

    n_slabs = t_pad // t_sub
    e_pad = out_ref.shape[-1]
    slab_rows = jax.lax.broadcasted_iota(jnp.int32, (t_sub, 1), 0)
    zeros_slab = jnp.zeros((t_sub, e_pad), dtype=out_ref.dtype)

    # ---- Phase 2: zero padding rows (no full-tile read-back) ---------------
    # TODO(synk): for highly ragged batches, a chunked gather (ceil(len/t_sub)
    # DMAs per sentence) would also cut the HBM over-read; kept fixed-window
    # here because manual-DMA sizes must be static.
    for g in range(group):
        copies[g].wait()
        len_g = lens[g]
        for s in range(n_slabs):
            base = s * t_sub

            # Slab is pure padding -> plain unmasked zero store, no read.
            @pl.when(base >= len_g)
            def _():
                out_ref[g, pl.ds(base, t_sub), :] = zeros_slab

            # Boundary slab (valid + pad rows) -> small t_sub-row RMW only.
            @pl.when(jnp.logical_and(base < len_g, base + t_sub > len_g))
            def _():
                slab = out_ref[g, pl.ds(base, t_sub), :]
                out_ref[g, pl.ds(base, t_sub), :] = jnp.where(
                    slab_rows < (len_g - base), slab, zeros_slab)


def fast_ner_pad(packed, offsets, lengths, t_max, *, group=None):
    """Pallas equivalent of the tensor assembly in TritonFastNERTagger.forward.

    packed:  [total_tokens, E] ragged concat of token embeddings
    offsets: [B] int32 start row of each sentence inside `packed`
    lengths: [B] int32 token count per sentence (must all be <= t_max)
    t_max:   longest sentence length in the batch (static int)
    returns: (lengths, sentence_tensor [B, t_max, E])
    """
    B = int(lengths.shape[0])
    E = int(packed.shape[-1])
    dtype = packed.dtype
    itemsize = jnp.dtype(dtype).itemsize

    # Dtype-aware sublane / lane rounding so the output block meets the min
    # tile and the writeback stays unmasked vst.
    t_sub = {4: 8, 2: 16, 1: 32}.get(itemsize, 8)
    t_pad = _round_up(max(int(t_max), 1), t_sub)
    e_pad = _round_up(E, 128)
    tile_bytes = t_pad * e_pad * itemsize

    # Group sizing: aim for a multi-MiB per-step tile (per-step overhead is
    # ~0.35us), cap so 2x(tile) stays far below scoped VMEM on all gens,
    # keep >= 2 grid steps for v7x megacore, and make group divide B so the
    # output needs no batch padding / trailing slice.
    if group is None:
        group = max(1, min((2 << 20) // tile_bytes, B))
    group = max(1, min(int(group), B))
    group = min(group, max(1, (8 << 20) // tile_bytes))
    if B >= 2:
        group = min(group, -(-B // 2))
    while B % group:
        group -= 1
    n_steps = B // group

    # Zero safety tail: the fixed t_pad-row DMA window of the last sentence
    # must never read past the packed buffer (DMA-side OOB is unchecked).
    # TODO(synk): in a real pipeline, allocate the ragged concat with this
    # t_pad zero tail (and E 128-aligned) at embedding time to skip this copy.
    packed_p = jnp.pad(packed, ((0, t_pad), (0, e_pad - E)))

    out_bytes = B * t_pad * e_pad * itemsize
    cost = pl.CostEstimate(
        flops=0, transcendentals=0,
        bytes_accessed=int(packed_p.size) * itemsize + out_bytes)

    vmem_limit = int(max(2 * group * tile_bytes + (2 << 20), 16 << 20))

    out = pl.pallas_call(
        functools.partial(_gather_pad_kernel,
                          t_pad=t_pad, t_sub=t_sub, group=group),
        out_shape=jax.ShapeDtypeStruct((B, t_pad, e_pad), dtype),
        grid_spec=pltpu.PrefetchScalarGridSpec(
            num_scalar_prefetch=2,                          # offsets, lengths -> SMEM
            grid=(n_steps,),
            in_specs=[pl.BlockSpec(memory_space=pl.ANY)],   # packed stays in HBM
            out_specs=pl.BlockSpec((group, t_pad, e_pad),
                                   lambda s, off, ln: (s, 0, 0)),
            scratch_shapes=[pltpu.SemaphoreType.DMA((group,))],
        ),
        compiler_params=pltpu.CompilerParams(
            dimension_semantics=("parallel",),
            vmem_limit_bytes=vmem_limit),
        cost_estimate=cost,
    )(offsets, lengths, packed_p)

    if (t_pad, e_pad) != (int(t_max), E):
        out = out[:, :int(t_max), :E]

    # TODO(synk): PyTorch returns torch.long (int64); JAX x64 is disabled by
    # default so lengths come back as int32 (values identical).
    return lengths, out


if __name__ == "__main__":
    key = jax.random.PRNGKey(0)
    B, T_MAX, E = 4, 12, 128           # batch=4, longest seq=12, embedding_length=128
    lengths_list = [12, 5, 9, 1]
    lengths = jnp.array(lengths_list, dtype=jnp.int32)

    # TODO(synk): `self.tagger.embed(sentences)` / token.get_each_embedding()
    # is Python-object traversal over flair Sentence/Token objects with no
    # tensor-op equivalent; modeled as deterministic synthetic embeddings.
    full_embs = jax.random.normal(key, (B, T_MAX, E), dtype=jnp.float32)

    # Ragged concat of the real token rows (what `torch.cat(all_embs)` sees
    # before per-sentence zero padding).
    full_np = np.asarray(full_embs)
    rows = [full_np[b, :lengths_list[b]] for b in range(B)]
    packed = jnp.asarray(np.concatenate(rows, axis=0))

    offsets = jnp.asarray(
        np.concatenate([[0], np.cumsum(lengths_list)[:-1]]).astype(np.int32))

    out_lengths, sentence_tensor = fast_ner_pad(packed, offsets, lengths, T_MAX)
    sentence_tensor = jax.block_until_ready(sentence_tensor)

    # Reference semantics: zero-padded [B, T_MAX, E] + lengths.
    t_ids = np.arange(T_MAX)[None, :, None]
    ref = np.where(t_ids < np.array(lengths_list)[:, None, None],
                   full_np, 0.0).astype(np.float32)
    assert np.allclose(np.asarray(sentence_tensor), ref, atol=1e-6)
    assert np.array_equal(np.asarray(out_lengths), np.array(lengths_list))
    print("KERNEL_OK")
</pallas_src>

<mosaic_0001>
module attributes {stable_mosaic.version = 11 : i64} {
  func.func @_gather_pad_kernel(%arg0: i32, %arg1: memref<4xi32, #tpu.memory_space<smem>>, %arg2: memref<4xi32, #tpu.memory_space<smem>>, %arg3: memref<43x128xf32, #tpu.memory_space<any>>, %arg4: memref<2x16x128xf32, #tpu.memory_space<vmem>>, %arg5: memref<2x!tpu.dma_semaphore, #tpu.memory_space<semaphore_mem>>) attributes {dimension_semantics = [#tpu.dimension_semantics<parallel>], iteration_bounds = array<i64: 2>, scalar_prefetch = 2 : i64, scratch_operands = 1 : i64, tpu.core_type = #tpu.core_type<tc>, window_params = [{}, {transform_indices = @transform_1, window_bounds = array<i64: 2, 16, 128>}]} {
    %c2_i32 = arith.constant 2 : i32
    %0 = arith.muli %arg0, %c2_i32 : i32
    %c0_i32 = arith.constant 0 : i32
    %1 = arith.addi %0, %c0_i32 : i32
    %2 = arith.index_cast %1 : i32 to index
    %3 = memref.load %arg1[%2] : memref<4xi32, #tpu.memory_space<smem>>
    %c2_i32_0 = arith.constant 2 : i32
    %4 = arith.muli %arg0, %c2_i32_0 : i32
    %c1_i32 = arith.constant 1 : i32
    %5 = arith.addi %4, %c1_i32 : i32
    %6 = arith.index_cast %5 : i32 to index
    %7 = memref.load %arg1[%6] : memref<4xi32, #tpu.memory_space<smem>>
    %c2_i32_1 = arith.constant 2 : i32
    %8 = arith.muli %arg0, %c2_i32_1 : i32
    %c0_i32_2 = arith.constant 0 : i32
    %9 = arith.addi %8, %c0_i32_2 : i32
    %10 = arith.index_cast %9 : i32 to index
    %11 = memref.load %arg2[%10] : memref<4xi32, #tpu.memory_space<smem>>
    %c2_i32_3 = arith.constant 2 : i32
    %12 = arith.muli %arg0, %c2_i32_3 : i32
    %c1_i32_4 = arith.constant 1 : i32
    %13 = arith.addi %12, %c1_i32_4 : i32
    %14 = arith.index_cast %13 : i32 to index
    %15 = memref.load %arg2[%14] : memref<4xi32, #tpu.memory_space<smem>>
    %c0_i32_5 = arith.constant 0 : i32
    %c0_i32_6 = arith.constant 0 : i32
    %c0_i32_7 = arith.constant 0 : i32
    %16 = tpu.memref_slice %arg3[%3, %c0_i32_7] : memref<43x128xf32, #tpu.memory_space<any>> -> memref<16x128xf32, #tpu.memory_space<any>>
    %c0_i32_8 = arith.constant 0 : i32
    %c0_i32_9 = arith.constant 0 : i32
    %17 = tpu.memref_slice %arg4[%c0_i32_5, %c0_i32_8, %c0_i32_9] : memref<2x16x128xf32, #tpu.memory_space<vmem>> -> memref<1x16x128xf32, #tpu.memory_space<vmem>>
    %18 = tpu.memref_squeeze %17 : memref<1x16x128xf32, #tpu.memory_space<vmem>> -> memref<16x128xf32, #tpu.memory_space<vmem>>
    %19 = tpu.memref_slice %arg5[%c0_i32_6] : memref<2x!tpu.dma_semaphore, #tpu.memory_space<semaphore_mem>> -> memref<1x!tpu.dma_semaphore, #tpu.memory_space<semaphore_mem>>
    %20 = tpu.memref_squeeze %19 : memref<1x!tpu.dma_semaphore, #tpu.memory_space<semaphore_mem>> -> memref<!tpu.dma_semaphore, #tpu.memory_space<semaphore_mem>>
    tpu.enqueue_dma source(%16 : memref<16x128xf32, #tpu.memory_space<any>>) target(%18 : memref<16x128xf32, #tpu.memory_space<vmem>>) target_semaphore(%20 : memref<!tpu.dma_semaphore, #tpu.memory_space<semaphore_mem>>)
    %c1_i32_10 = arith.constant 1 : i32
    %c1_i32_11 = arith.constant 1 : i32
    %c0_i32_12 = arith.constant 0 : i32
    %21 = tpu.memref_slice %arg3[%7, %c0_i32_12] : memref<43x128xf32, #tpu.memory_space<any>> -> memref<16x128xf32, #tpu.memory_space<any>>
    %c0_i32_13 = arith.constant 0 : i32
    %c0_i32_14 = arith.constant 0 : i32
    %22 = tpu.memref_slice %arg4[%c1_i32_10, %c0_i32_13, %c0_i32_14] : memref<2x16x128xf32, #tpu.memory_space<vmem>> -> memref<1x16x128xf32, #tpu.memory_space<vmem>>
    %23 = tpu.memref_squeeze %22 : memref<1x16x128xf32, #tpu.memory_space<vmem>> -> memref<16x128xf32, #tpu.memory_space<vmem>>
    %24 = tpu.memref_slice %arg5[%c1_i32_11] : memref<2x!tpu.dma_semaphore, #tpu.memory_space<semaphore_mem>> -> memref<1x!tpu.dma_semaphore, #tpu.memory_space<semaphore_mem>>
    %25 = tpu.memref_squeeze %24 : memref<1x!tpu.dma_semaphore, #tpu.memory_space<semaphore_mem>> -> memref<!tpu.dma_semaphore, #tpu.memory_space<semaphore_mem>>
    tpu.enqueue_dma source(%21 : memref<16x128xf32, #tpu.memory_space<any>>) target(%23 : memref<16x128xf32, #tpu.memory_space<vmem>>) target_semaphore(%25 : memref<!tpu.dma_semaphore, #tpu.memory_space<semaphore_mem>>)
    %26 = tpu.iota {dimensions = array<i32: 0>} : vector<8x1xi32>
    %cst = arith.constant 0.000000e+00 : f32
    %27 = vector.broadcast %cst : f32 to vector<8x128xf32>
    %c0_i32_15 = arith.constant 0 : i32
    %c0_i32_16 = arith.constant 0 : i32
    %c0_i32_17 = arith.constant 0 : i32
    %28 = tpu.memref_slice %arg3[%3, %c0_i32_17] : memref<43x128xf32, #tpu.memory_space<any>> -> memref<16x128xf32, #tpu.memory_space<any>>
    %c0_i32_18 = arith.constant 0 : i32
    %c0_i32_19 = arith.constant 0 : i32
    %29 = tpu.memref_slice %arg4[%c0_i32_15, %c0_i32_18, %c0_i32_19] : memref<2x16x128xf32, #tpu.memory_space<vmem>> -> memref<1x16x128xf32, #tpu.memory_space<vmem>>
    %30 = tpu.memref_squeeze %29 : memref<1x16x128xf32, #tpu.memory_space<vmem>> -> memref<16x128xf32, #tpu.memory_space<vmem>>
    %31 = tpu.memref_slice %arg5[%c0_i32_16] : memref<2x!tpu.dma_semaphore, #tpu.memory_space<semaphore_mem>> -> memref<1x!tpu.dma_semaphore, #tpu.memory_space<semaphore_mem>>
    %32 = tpu.memref_squeeze %31 : memref<1x!tpu.dma_semaphore, #tpu.memory_space<semaphore_mem>> -> memref<!tpu.dma_semaphore, #tpu.memory_space<semaphore_mem>>
    tpu.wait_dma2 semaphore(%32 : memref<!tpu.dma_semaphore, #tpu.memory_space<semaphore_mem>>) src(%28 : memref<16x128xf32, #tpu.memory_space<any>>) dst(%30 : memref<16x128xf32, #tpu.memory_space<vmem>>)
    %c0_i32_20 = arith.constant 0 : i32
    %33 = arith.cmpi sle, %11, %c0_i32_20 : i32
    %34 = arith.extui %33 : i1 to i32
    %c0_i32_21 = arith.constant 0 : i32
    %35 = arith.cmpi ne, %34, %c0_i32_21 : i32
    scf.if %35 {
      %c0 = arith.constant 0 : index
      %c0_43 = arith.constant 0 : index
      %c0_44 = arith.constant 0 : index
      %70 = vector.load %arg4[%c0, %c0_43, %c0_44] : memref<2x16x128xf32, #tpu.memory_space<vmem>>, vector<1x8x128xf32>
      %71 = vector.shape_cast %70 : vector<1x8x128xf32> to vector<8x128xf32>
      %72 = vector.shape_cast %27 : vector<8x128xf32> to vector<1x8x128xf32>
      tpu.vector_store %arg4[%c0, %c0_43, %c0_44], %72 {strides = array<i32>} : memref<2x16x128xf32, #tpu.memory_space<vmem>>, vector<1x8x128xf32>,
    } else {
    }
    %c0_i32_22 = arith.constant 0 : i32
    %36 = arith.cmpi sgt, %11, %c0_i32_22 : i32
    %c8_i32 = arith.constant 8 : i32
    %37 = arith.cmpi slt, %11, %c8_i32 : i32
    %38 = arith.andi %36, %37 : i1
    %39 = arith.extui %38 : i1 to i32
    %c0_i32_23 = arith.constant 0 : i32
    %40 = arith.cmpi ne, %39, %c0_i32_23 : i32
    scf.if %40 {
      %c0 = arith.constant 0 : index
      %c0_43 = arith.constant 0 : index
      %c0_44 = arith.constant 0 : index
      %70 = vector.load %arg4[%c0, %c0_43, %c0_44] : memref<2x16x128xf32, #tpu.memory_space<vmem>>, vector<1x8x128xf32>
      %71 = vector.shape_cast %70 : vector<1x8x128xf32> to vector<8x128xf32>
      %c0_i32_45 = arith.constant 0 : i32
      %72 = arith.subi %11, %c0_i32_45 : i32
      %73 = vector.broadcast %72 : i32 to vector<8x1xi32>
      %74 = arith.cmpi slt, %26, %73 : vector<8x1xi32>
      %75 = vector.shape_cast %74 : vector<8x1xi1> to vector<8x1xi1>
      %76 = vector.broadcast %75 : vector<8x1xi1> to vector<8x128xi1>
      %77 = arith.select %76, %71, %27 : vector<8x128xi1>, vector<8x128xf32>
      %c0_46 = arith.constant 0 : index
      %c0_47 = arith.constant 0 : index
      %c0_48 = arith.constant 0 : index
      %78 = vector.load %arg4[%c0_46, %c0_47, %c0_48] : memref<2x16x128xf32, #tpu.memory_space<vmem>>, vector<1x8x128xf32>
      %79 = vector.shape_cast %78 : vector<1x8x128xf32> to vector<8x128xf32>
      %80 = vector.shape_cast %77 : vector<8x128xf32> to vector<1x8x128xf32>
      tpu.vector_store %arg4[%c0_46, %c0_47, %c0_48], %80 {strides = array<i32>} : memref<2x16x128xf32, #tpu.memory_space<vmem>>, vector<1x8x128xf32>,
    } else {
    }
    %c8_i32_24 = arith.constant 8 : i32
    %41 = arith.cmpi sle, %11, %c8_i32_24 : i32
    %42 = arith.extui %41 : i1 to i32
    %c0_i32_25 = arith.constant 0 : i32
    %43 = arith.cmpi ne, %42, %c0_i32_25 : i32
    scf.if %43 {
      %c0 = arith.constant 0 : index
      %c8 = arith.constant 8 : index
      %c0_43 = arith.constant 0 : index
      %70 = vector.load %arg4[%c0, %c8, %c0_43] : memref<2x16x128xf32, #tpu.memory_space<vmem>>, vector<1x8x128xf32>
      %71 = vector.shape_cast %70 : vector<1x8x128xf32> to vector<8x128xf32>
      %72 = vector.shape_cast %27 : vector<8x128xf32> to vector<1x8x128xf32>
      tpu.vector_store %arg4[%c0, %c8, %c0_43], %72 {strides = array<i32>} : memref<2x16x128xf32, #tpu.memory_space<vmem>>, vector<1x8x128xf32>,
    } else {
    }
    %c8_i32_26 = arith.constant 8 : i32
    %44 = arith.cmpi sgt, %11, %c8_i32_26 : i32
    %c16_i32 = arith.constant 16 : i32
    %45 = arith.cmpi slt, %11, %c16_i32 : i32
    %46 = arith.andi %44, %45 : i1
    %47 = arith.extui %46 : i1 to i32
    %c0_i32_27 = arith.constant 0 : i32
    %48 = arith.cmpi ne, %47, %c0_i32_27 : i32
    scf.if %48 {
      %c0 = arith.constant 0 : index
      %c8 = arith.constant 8 : index
      %c0_43 = arith.constant 0 : index
      %70 = vector.load %arg4[%c0, %c8, %c0_43] : memref<2x16x128xf32, #tpu.memory_space<vmem>>, vector<1x8x128xf32>
      %71 = vector.shape_cast %70 : vector<1x8x128xf32> to vector<8x128xf32>
      %c8_i32_44 = arith.constant 8 : i32
      %72 = arith.subi %11, %c8_i32_44 : i32
      %73 = vector.broadcast %72 : i32 to vector<8x1xi32>
      %74 = arith.cmpi slt, %26, %73 : vector<8x1xi32>
      %75 = vector.shape_cast %74 : vector<8x1xi1> to vector<8x1xi1>
      %76 = vector.broadcast %75 : vector<8x1xi1> to vector<8x128xi1>
      %77 = arith.select %76, %71, %27 : vector<8x128xi1>, vector<8x128xf32>
      %c0_45 = arith.constant 0 : index
      %c8_46 = arith.constant 8 : index
      %c0_47 = arith.constant 0 : index
      %78 = vector.load %arg4[%c0_45, %c8_46, %c0_47] : memref<2x16x128xf32, #tpu.memory_space<vmem>>, vector<1x8x128xf32>
      %79 = vector.shape_cast %78 : vector<1x8x128xf32> to vector<8x128xf32>
      %80 = vector.shape_cast %77 : vector<8x128xf32> to vector<1x8x128xf32>
      tpu.vector_store %arg4[%c0_45, %c8_46, %c0_47], %80 {strides = array<i32>} : memref<2x16x128xf32, #tpu.memory_space<vmem>>, vector<1x8x128xf32>,
    } else {
    }
    %c1_i32_28 = arith.constant 1 : i32
    %c1_i32_29 = arith.constant 1 : i32
    %c0_i32_30 = arith.constant 0 : i32
    %49 = tpu.memref_slice %arg3[%7, %c0_i32_30] : memref<43x128xf32, #tpu.memory_space<any>> -> memref<16x128xf32, #tpu.memory_space<any>>
    %c0_i32_31 = arith.constant 0 : i32
    %c0_i32_32 = arith.constant 0 : i32
    %50 = tpu.memref_slice %arg4[%c1_i32_28, %c0_i32_31, %c0_i32_32] : memref<2x16x128xf32, #tpu.memory_space<vmem>> -> memref<1x16x128xf32, #tpu.memory_space<vmem>>
    %51 = tpu.memref_squeeze %50 : memref<1x16x128xf32, #tpu.memory_space<vmem>> -> memref<16x128xf32, #tpu.memory_space<vmem>>
    %52 = tpu.memref_slice %arg5[%c1_i32_29] : memref<2x!tpu.dma_semaphore, #tpu.memory_space<semaphore_mem>> -> memref<1x!tpu.dma_semaphore, #tpu.memory_space<semaphore_mem>>
    %53 = tpu.memref_squeeze %52 : memref<1x!tpu.dma_semaphore, #tpu.memory_space<semaphore_mem>> -> memref<!tpu.dma_semaphore, #tpu.memory_space<semaphore_mem>>
    tpu.wait_dma2 semaphore(%53 : memref<!tpu.dma_semaphore, #tpu.memory_space<semaphore_mem>>) src(%49 : memref<16x128xf32, #tpu.memory_space<any>>) dst(%51 : memref<16x128xf32, #tpu.memory_space<vmem>>)
    %c0_i32_33 = arith.constant 0 : i32
    %54 = arith.cmpi sle, %15, %c0_i32_33 : i32
    %55 = arith.extui %54 : i1 to i32
    %c0_i32_34 = arith.constant 0 : i32
    %56 = arith.cmpi ne, %55, %c0_i32_34 : i32
    scf.if %56 {
      %c1 = arith.constant 1 : index
      %c0 = arith.constant 0 : index
      %c0_43 = arith.constant 0 : index
      %70 = vector.load %arg4[%c1, %c0, %c0_43] : memref<2x16x128xf32, #tpu.memory_space<vmem>>, vector<1x8x128xf32>
      %71 = vector.shape_cast %70 : vector<1x8x128xf32> to vector<8x128xf32>
      %72 = vector.shape_cast %27 : vector<8x128xf32> to vector<1x8x128xf32>
      tpu.vector_store %arg4[%c1, %c0, %c0_43], %72 {strides = array<i32>} : memref<2x16x128xf32, #tpu.memory_space<vmem>>, vector<1x8x128xf32>,
    } else {
    }
    %c0_i32_35 = arith.constant 0 : i32
    %57 = arith.cmpi sgt, %15, %c0_i32_35 : i32
    %c8_i32_36 = arith.constant 8 : i32
    %58 = arith.cmpi slt, %15, %c8_i32_36 : i32
    %59 = arith.andi %57, %58 : i1
    %60 = arith.extui %59 : i1 to i32
    %c0_i32_37 = arith.constant 0 : i32
    %61 = arith.cmpi ne, %60, %c0_i32_37 : i32
    scf.if %61 {
      %c1 = arith.constant 1 : index
      %c0 = arith.constant 0 : index
      %c0_43 = arith.constant 0 : index
      %70 = vector.load %arg4[%c1, %c0, %c0_43] : memref<2x16x128xf32, #tpu.memory_space<vmem>>, vector<1x8x128xf32>
      %71 = vector.shape_cast %70 : vector<1x8x128xf32> to vector<8x128xf32>
      %c0_i32_44 = arith.constant 0 : i32
      %72 = arith.subi %15, %c0_i32_44 : i32
      %73 = vector.broadcast %72 : i32 to vector<8x1xi32>
      %74 = arith.cmpi slt, %26, %73 : vector<8x1xi32>
      %75 = vector.shape_cast %74 : vector<8x1xi1> to vector<8x1xi1>
      %76 = vector.broadcast %75 : vector<8x1xi1> to vector<8x128xi1>
      %77 = arith.select %76, %71, %27 : vector<8x128xi1>, vector<8x128xf32>
      %c1_45 = arith.constant 1 : index
      %c0_46 = arith.constant 0 : index
      %c0_47 = arith.constant 0 : index
      %78 = vector.load %arg4[%c1_45, %c0_46, %c0_47] : memref<2x16x128xf32, #tpu.memory_space<vmem>>, vector<1x8x128xf32>
      %79 = vector.shape_cast %78 : vector<1x8x128xf32> to vector<8x128xf32>
      %80 = vector.shape_cast %77 : vector<8x128xf32> to vector<1x8x128xf32>
      tpu.vector_store %arg4[%c1_45, %c0_46, %c0_47], %80 {strides = array<i32>} : memref<2x16x128xf32, #tpu.memory_space<vmem>>, vector<1x8x128xf32>,
    } else {
    }
    %c8_i32_38 = arith.constant 8 : i32
    %62 = arith.cmpi sle, %15, %c8_i32_38 : i32
    %63 = arith.extui %62 : i1 to i32
    %c0_i32_39 = arith.constant 0 : i32
    %64 = arith.cmpi ne, %63, %c0_i32_39 : i32
    scf.if %64 {
      %c1 = arith.constant 1 : index
      %c8 = arith.constant 8 : index
      %c0 = arith.constant 0 : index
      %70 = vector.load %arg4[%c1, %c8, %c0] : memref<2x16x128xf32, #tpu.memory_space<vmem>>, vector<1x8x128xf32>
      %71 = vector.shape_cast %70 : vector<1x8x128xf32> to vector<8x128xf32>
      %72 = vector.shape_cast %27 : vector<8x128xf32> to vector<1x8x128xf32>
      tpu.vector_store %arg4[%c1, %c8, %c0], %72 {strides = array<i32>} : memref<2x16x128xf32, #tpu.memory_space<vmem>>, vector<1x8x128xf32>,
    } else {
    }
    %c8_i32_40 = arith.constant 8 : i32
    %65 = arith.cmpi sgt, %15, %c8_i32_40 : i32
    %c16_i32_41 = arith.constant 16 : i32
    %66 = arith.cmpi slt, %15, %c16_i32_41 : i32
    %67 = arith.andi %65, %66 : i1
    %68 = arith.extui %67 : i1 to i32
    %c0_i32_42 = arith.constant 0 : i32
    %69 = arith.cmpi ne, %68, %c0_i32_42 : i32
    scf.if %69 {
      %c1 = arith.constant 1 : index
      %c8 = arith.constant 8 : index
      %c0 = arith.constant 0 : index
      %70 = vector.load %arg4[%c1, %c8, %c0] : memref<2x16x128xf32, #tpu.memory_space<vmem>>, vector<1x8x128xf32>
      %71 = vector.shape_cast %70 : vector<1x8x128xf32> to vector<8x128xf32>
      %c8_i32_43 = arith.constant 8 : i32
      %72 = arith.subi %15, %c8_i32_43 : i32
      %73 = vector.broadcast %72 : i32 to vector<8x1xi32>
      %74 = arith.cmpi slt, %26, %73 : vector<8x1xi32>
      %75 = vector.shape_cast %74 : vector<8x1xi1> to vector<8x1xi1>
      %76 = vector.broadcast %75 : vector<8x1xi1> to vector<8x128xi1>
      %77 = arith.select %76, %71, %27 : vector<8x128xi1>, vector<8x128xf32>
      %c1_44 = arith.constant 1 : index
      %c8_45 = arith.constant 8 : index
      %c0_46 = arith.constant 0 : index
      %78 = vector.load %arg4[%c1_44, %c8_45, %c0_46] : memref<2x16x128xf32, #tpu.memory_space<vmem>>, vector<1x8x128xf32>
      %79 = vector.shape_cast %78 : vector<1x8x128xf32> to vector<8x128xf32>
      %80 = vector.shape_cast %77 : vector<8x128xf32> to vector<1x8x128xf32>
      tpu.vector_store %arg4[%c1_44, %c8_45, %c0_46], %80 {strides = array<i32>} : memref<2x16x128xf32, #tpu.memory_space<vmem>>, vector<1x8x128xf32>,
    } else {
    }
    return
  }
  func.func @transform_1(%arg0: i32, %arg1: memref<4xi32, #tpu.memory_space<smem>>, %arg2: memref<4xi32, #tpu.memory_space<smem>>) -> (i32, i32, i32) {
    %c0_i32 = arith.constant 0 : i32
    %c0_i32_0 = arith.constant 0 : i32
    %c0_i32_1 = arith.constant 0 : i32
    return %arg0, %c0_i32, %c0_i32_0 : i32, i32, i32
  }
}

</mosaic_0001>

<bundles_post_ra>
// kernel: tpu_custom_call.1
= control target key start
LH: loop header
LB: loop body
LE: loop exit
PB: predicated region body
PF: predicated region fallthrough
CT: control target
= control target key end

     0   :  { %s443_s12 = smov [#allocation4]   ;;  %s638_s0 = inlined_call_operand.hbm [shape: s32[4], index: 0, kind: input, shape index: {}]   ;;  %s639_s2 = inlined_call_operand.hbm [shape: f32[43,128], index: 2, kind: input, shape index: {}]   ;;  %s640_s3 = inlined_call_operand.hbm [shape: f32[4,16,128], index: 3, kind: output, shape index: {}]   ;;  %s641_s1 = inlined_call_operand.vmem [shape: s32[4], index: 1, kind: input, shape index: {}]  }
   0x1   :  { %9 = dma.hbm_to_smem %s638_s0, 16, %s443_s12, [#allocation3] }
   0x2   :  { %s10_s17 = sshll.u32 %s641_s1, 4  ;;  %s11_s17 = int_to_ptr.vmem [resolvable:$true] %s10_s17 }
   0x3   :  { %s327_s18 = scalar_lea.vmem %s11_s17, 16  ;;  %p332_p1 = scmp.lt.s32.totalorder %s11_s17, %s11_s17 }
   0x4   :  { %p328_p0 = scmp.ne.s32.totalorder %s11_s17, %s327_s18  ;;  %p333_p2 = scmp.lt.s32.totalorder %s327_s18, %s327_s18 }
   0x6   :  { %p334_p3 = por %p333_p2, %p332_p1 }
   0x8   :  { %p335_p4 = pnand %p334_p3, %p328_p0 }
   0xa   :  { %338 = shalt.err (!%p335_p4)  }
   0xb   :  { %s444_s19 = smov [#allocation5]  }
   0xc   :  { %13 = dma.vmem_to_smem %s11_s17, 16, %s444_s19, [#allocation3] }
   0xd   :  { %421 = dma.done.wait [#allocation3], 32 }
   0xe   :  { %422 = vsyncadd [#allocation3], 4294967264 }
   0xf   :  { %15 = sfence }
  0x10   :  { %16 = vsyncpa [#allocation7], 0 }
  0x11   :  { %18 = vsyncpa [#allocation7 + $0x1], 0  ;;  %s478_s0 = smov 0   ;;  %s480_s20 = smov 0  }
  0x12   :  { %s482_s1 = smov 0  }
  0x13 LB: > { %s251_s21 = sadd.s32 4294967295, %s441_s1   ;;  %s495_s22 = sadd.s32 1, %s441_s1   ;;  %s441_s1 = sphi %s482_s1, %s646_s1   ;;  %s437_s20 = sphi %s480_s20, %s645_s20   ;;  %s433_s0 = sphi %s478_s0, %s644_s0  }
  0x14   : > { %s27_s23 = ssub.s32 %s441_s1, %s495_s22  ;;  %s30_s24 = sadd.s32 1, %s437_s20 }
  0x15   : > { %p28_p5 = scmp.eq.s32.totalorder %s27_s23, 0  ;;  %p252_p6 = scmp.ne.s32.totalorder %s27_s23, 0 }
  0x16   : > { %p34_p7 = scmp.eq.s32.totalorder %s441_s1, 1  ;;  %p39_p8 = scmp.ne.s32.totalorder %s437_s20, %s433_s0 }
  0x17   : > { %s504_s25 = scalar_select %p28_p5, %s437_s20, %s30_s24  }
  0x18   : > { %p506_p9 = por %p252_p6, %p34_p7  ;;  %p40_p10 = scmp.eq.s32.totalorder %s251_s21, 1 }
  0x19   : > { %p253_p12 = scmp.ge.s32.totalorder %s441_s1, 2 }
  0x1a   : > { %p510_p11 = por %p40_p10, %p39_p8  ;;  %s54_s28 = sand.u32 (!%p253_p12), 1, %s437_s20  }
  0x1b   : > { %49 = sbr.rel (%p253_p12) target bundleno = 187 (0xbb), region = 12  ;;  %s255_s29 = sshll.u32 (!%p253_p12), %s441_s1, 1 }
  0x1c   : > { %s254_s30 = sshll.u32 (!%p253_p12), %s54_s28, 5  ;;  %s59_s4 = sld [smem:[#allocation4 + %s255_s29]] (!%p253_p12) }
  0x1d   : > { %s519_s5 = sld [smem:[#allocation5 + %s255_s29]] (!%p253_p12)  ;;  %s523_s6 = scalar_lea.vmem (!%p253_p12), [#allocation6], %s254_s30 }
  0x1e   : > { %s73_s7 = sshll.u32 (!%p253_p12), %s523_s6, 4  ;;  %s60_s8 = sadd.s32 (!%p253_p12), 1, %s255_s29  ;;  %s531_s7 = int_to_ptr.vmem [resolvable:$true] %s73_s7 }
  0x1f   : > { %s526_s9 = sld [smem:[#allocation4 + %s60_s8]] (!%p253_p12)  ;;  %s79_s11 = scalar_lea.vmem (!%p253_p12), %s523_s6, 16 [#allocation6] }
  0x20   : > { %v92_v0 = vlaneseq  ;;  %s528_s10 = sld [smem:[#allocation5 + %s60_s8]]  ;;  %s88_s12 = sshll.u32 %s79_s11, 4  ;;  %s536_s12 = int_to_ptr.vmem [resolvable:$true] %s88_s12 }
  0x21   : > { %s341_s21 = scalar_lea.hbm %s639_s2, 768 }
  0x22   : > { %v521_v1 = vshrl.u32 %v92_v0, 7  ;;  %s256_s13 = sshll.u32 %s59_s4, 4 }
  0x23   : > { %s65_s16 = scalar_lea.hbm %s639_s2, %s256_s13 }
  0x24   : > { %s339_s17 = scalar_lea.hbm %s65_s16, 256  ;;  %p342_p0 = scmp.lt.s32.totalorder %s65_s16, %s639_s2 }
  0x25   : > { %p340_p13 = scmp.ne.s32.totalorder %s65_s16, %s339_s17  ;;  %p343_p1 = scmp.lt.s32.totalorder %s341_s21, %s339_s17 }
  0x27   : > { %p344_p2 = por %p343_p1, %p342_p0 }
  0x29   : > { %p345_p3 = pnand %p344_p2, %p340_p13 }
  0x2b   : > { %348 = shalt.err (!%p345_p3)  }
  0x2c   : > { %s349_s29 = scalar_lea.vmem %s531_s7, 256  ;;  %s445_s30 = smov [#allocation6]  }
  0x2d   : > { %p350_p4 = scmp.ne.s32.totalorder %s531_s7, %s349_s29  ;;  %s351_s4 = sshll.u32 %s445_s30, 4  ;;  %s546_s4 = int_to_ptr.vmem [resolvable:$false] %s351_s4 }
  0x2e   : > { %s549_s8 = scalar_lea.vmem %s546_s4, 1024  ;;  %p354_p5 = scmp.lt.s32.totalorder %s531_s7, %s546_s4 }
  0x2f   : > { %p355_p6 = scmp.lt.s32.totalorder %s549_s8, %s349_s29 }
  0x31   : > { %p356_p7 = por %p355_p6, %p354_p5 }
  0x33   : > { %p357_p8 = pnand %p356_p7, %p350_p4 }
  0x35   : > { %360 = shalt.err (!%p357_p8)  }
  0x36   : > { %76 = dma.hbm_to_vmem [thread:$0]  %s65_s16, 256, %s531_s7, [#allocation2] }
  0x37   : > { %s257_s11 = sshll.u32 %s526_s9, 4 }
  0x38   : > { %s78_s15 = scalar_lea.hbm %s639_s2, %s257_s11 }
  0x39   : > { %s361_s17 = scalar_lea.hbm %s78_s15, 256  ;;  %p364_p12 = scmp.lt.s32.totalorder %s78_s15, %s639_s2 }
  0x3a   : > { %p362_p10 = scmp.ne.s32.totalorder %s78_s15, %s361_s17  ;;  %p365_p13 = scmp.lt.s32.totalorder %s341_s21, %s361_s17 }
  0x3c   : > { %p366_p0 = por %p365_p13, %p364_p12 }
  0x3e   : > { %p367_p1 = pnand %p366_p0, %p362_p10 }
  0x40   : > { %370 = shalt.err (!%p367_p1)  }
  0x41   : > { %s371_s9 = scalar_lea.vmem %s536_s12, 256  ;;  %p376_p3 = scmp.lt.s32.totalorder %s536_s12, %s546_s4 }
  0x42   : > { %p372_p2 = scmp.ne.s32.totalorder %s536_s12, %s371_s9  ;;  %p377_p4 = scmp.lt.s32.totalorder %s549_s8, %s371_s9 }
  0x44   : > { %p378_p6 = por %p377_p4, %p376_p3 }
  0x46   : > { %p379_p7 = pnand %p378_p6, %p372_p2 }
  0x48   : > { %382 = shalt.err (!%p379_p7)  }
  0x49   : > { %91 = dma.hbm_to_vmem [thread:$0]  %s78_s15, 256, %s536_s12, [#allocation2 + $0x1] }
  0x4a   : > { %423 = dma.done.wait [#allocation2], 256 }
  0x4b   : > { %424 = vsyncadd [#allocation2], 4294967040  ;;  %p258_p8 = scmp.gt.s32.totalorder %s519_s5, 0 }
  0x4d   : > { %100 = sbr.rel (%p258_p8) target bundleno = 84 (0x54), region = 24 }
  0x52   : > { %v446_v2 = vmov 0.0  }
  0x53   : > { %101 = vst [vmem:[%s523_s6] sm:$0xff] %v446_v2 }
  0x54 PF: > { %p103_p10 = scmp.lt.s32.totalorder %s519_s5, 8 }
  0x56   : > { %p104_p12 = pnand %p258_p8, %p103_p10 }
  0x58   : > { %107 = sbr.rel (%p104_p12) target bundleno = 97 (0x61), region = 28 }
  0x5d   : > { %v108_v3 = vld [vmem:[%s523_s6] sm:$0xff]  ;;  %v109_v4 = vstv %s519_s5 }
  0x5e   : > { %vm110_vm0 = vcmp.lt.s32.totalorder %v521_v1, %v109_v4 }
  0x5f   : > { %v113_v5 = vsel %vm110_vm0, %v108_v3, 0.0 }
  0x60   : > { %114 = vst [vmem:[%s523_s6] sm:$0xff] %v113_v5 }
  0x61 PF: > { %p259_p13 = scmp.gt.s32.totalorder %s519_s5, 8 }
  0x63   : > { %118 = sbr.rel (%p259_p13) target bundleno = 106 (0x6a), region = 32 }
  0x68   : > { %v447_v6 = vmov 0.0  }
  0x69   : > { %119 = vst [vmem:[%s523_s6 + $0x8] sm:$0xff] %v447_v6 }
  0x6a PF: > { %p121_p0 = scmp.lt.s32.totalorder %s519_s5, 16 }
  0x6c   : > { %p122_p1 = pnand %p259_p13, %p121_p0 }
  0x6d   : > { %s260_s12 = sadd.s32 (!%p122_p1), 4294967288, %s519_s5 }
  0x6e   : > { %125 = sbr.rel (%p122_p1) target bundleno = 119 (0x77), region = 36 }
  0x73   : > { %v126_v7 = vld [vmem:[%s523_s6 + $0x8] sm:$0xff]  ;;  %v128_v8 = vstv %s260_s12 }
  0x74   : > { %vm129_vm1 = vcmp.lt.s32.totalorder %v521_v1, %v128_v8 }
  0x75   : > { %v132_v9 = vsel %vm129_vm1, %v126_v7, 0.0 }
  0x76   : > { %133 = vst [vmem:[%s523_s6 + $0x8] sm:$0xff] %v132_v9 }
  0x77 PF: > { %425 = dma.done.wait [#allocation2 + $0x1], 256 }
  0x78   : > { %426 = vsyncadd [#allocation2 + $0x1], 4294967040  ;;  %p261_p2 = scmp.gt.s32.totalorder %s528_s10, 0 }
  0x7a   : > { %139 = sbr.rel (%p261_p2) target bundleno = 129 (0x81), region = 40 }
  0x7f   : > { %v448_v10 = vmov 0.0  }
  0x80   : > { %262 = vst [vmem:[%s523_s6 + $0x10] sm:$0xff] %v448_v10 }
  0x81 PF: > { %p142_p3 = scmp.lt.s32.totalorder %s528_s10, 8 }
  0x83   : > { %p143_p4 = pnand %p261_p2, %p142_p3 }
  0x85   : > { %146 = sbr.rel (%p143_p4) target bundleno = 142 (0x8e), region = 44 }
  0x8a   : > { %v263_v11 = vld [vmem:[%s523_s6 + $0x10] sm:$0xff]  ;;  %v148_v12 = vstv %s528_s10 }
  0x8b   : > { %vm149_vm2 = vcmp.lt.s32.totalorder %v521_v1, %v148_v12 }
  0x8c   : > { %v152_v13 = vsel %vm149_vm2, %v263_v11, 0.0 }
  0x8d   : > { %264 = vst [vmem:[%s523_s6 + $0x10] sm:$0xff] %v152_v13 }
  0x8e PF: > { %p265_p6 = scmp.gt.s32.totalorder %s528_s10, 8 }
  0x90   : > { %157 = sbr.rel (%p265_p6) target bundleno = 151 (0x97), region = 48 }
  0x95   : > { %v449_v14 = vmov 0.0  }
  0x96   : > { %266 = vst [vmem:[%s523_s6 + $0x18] sm:$0xff] %v449_v14 }
  0x97 PF: > { %p160_p7 = scmp.lt.s32.totalorder %s528_s10, 16 }
  0x99   : > { %p161_p8 = pnand %p265_p6, %p160_p7 }
  0x9a   : > { %s268_s5 = sadd.s32 (!%p161_p8), 4294967288, %s528_s10 }
  0x9b   : > { %164 = sbr.rel (%p161_p8) target bundleno = 164 (0xa4), region = 52 }
  0xa0   : > { %v267_v15 = vld [vmem:[%s523_s6 + $0x18] sm:$0xff]  ;;  %v167_v16 = vstv %s268_s5 }
  0xa1   : > { %vm168_vm3 = vcmp.lt.s32.totalorder %v521_v1, %v167_v16 }
  0xa2   : > { %v171_v17 = vsel %vm168_vm3, %v267_v15, 0.0 }
  0xa3   : > { %269 = vst [vmem:[%s523_s6 + $0x18] sm:$0xff] %v171_v17 }
  0xa4 PF: > { %s279_s16 = sshll.u32 %s441_s1, 9  ;;  %s174_s10 = scalar_lea.sflag [#allocation7], %s54_s28 }
  0xa5   : > { %s187_s24 = scalar_lea.hbm %s640_s3, %s279_s16  ;;  %s383_s29 = scalar_lea.vmem %s531_s7, 512 }
  0xa6   : > { %p384_p10 = scmp.ne.s32.totalorder %s531_s7, %s383_s29  ;;  %p391_p0 = scmp.lt.s32.totalorder %s549_s8, %s383_s29 }
  0xa8   : > { %p385_p12 = pnand %p384_p10, %p506_p9  ;;  %p392_p1 = por %p391_p0, %p354_p5 }
  0xaa   : > { %p386_p13 = pneg %p385_p12 }
  0xac   : > { %p393_p2 = pnand %p392_p1, %p386_p13 }
  0xae   : > { %396 = shalt.err (!%p393_p2)
}
  0xaf   : > { %s397_s6 = scalar_lea.hbm %s187_s24, 512  ;;  %s401_s28 = scalar_lea.hbm %s640_s3, 1024 }
  0xb0   : > { %p398_p3 = scmp.ne.s32.totalorder %s187_s24, %s397_s6  ;;  %p402_p7 = scmp.lt.s32.totalorder %s187_s24, %s640_s3 }
  0xb1   : > { %p403_p8 = scmp.lt.s32.totalorder %s401_s28, %s397_s6 }
  0xb2   : > { %p399_p4 = pnand %p398_p3, %p506_p9 }
  0xb3   : > { %p404_p10 = por %p403_p8, %p402_p7 }
  0xb4   : > { %p400_p6 = pneg %p399_p4 }
  0xb6   : > { %p405_p12 = pnand %p404_p10, %p400_p6 }
  0xb8   : > { %408 = shalt.err (!%p405_p12)
}
  0xb9   : > { %s450_s4 = smov 128   ;;  %s451_s8 = smov 8  }
  0xba   : > { %280 = dma.vmem_to_hbm [thread:$0]  (%p506_p9), %s531_s7, 512, %s187_s24, %s174_s10, %s450_s4, %s450_s4, %s451_s8  }
  0xbb PF: > { %p286_p5 = scmp.ge.s32.totalorder %s441_s1, 1  ;;  %s203_s15 = sand.u32 1, %s433_s0  }
  0xbc   : > { %s204_s17 = scalar_lea.sflag [#allocation7], %s203_s15 }
  0xbd   : > { %p283_p13 = pnand %p286_p5, %p510_p11 }
  0xbf   : > { %p284_p0 = pneg %p283_p13 }
  0xc1   : > { %428 = dma.done.wait (%p284_p0), %s204_s17, 512  }
  0xc2   : > { %430 = vsyncadd (%p284_p0), %s204_s17, 4294966784  ;;  %p21_p1 = scmp.ge.s32.totalorder %s495_s22, 3   ;;  %s644_s0 = smov %s437_s20 }
  0xc3   : > { %s645_s20 = smov %s504_s25  ;;  %s646_s1 = smov %s495_s22 }
  0xc4   :  { %23 = sbr.rel (!%p21_p1) target bundleno = 19 (0x13), region = 89 }
  0xc9   :  { %209 = vsyncpa [#allocation7], 1 }
  0xca   :  { %211 = vsyncpa [#allocation7 + $0x1], 1 }
  0xcb   :  { %212 = vsyncmov [#allocation2] }
  0xce   :  { %s213_s1 = vpop.sfrf %212 }
  0xcf   :  { %p276_p9 = scmp.ne.s32.totalorder %s213_s1, 0 }
  0xd1   :  { %217 = shalt.err (%p276_p9)  }
  0xd2   :  { %219 = vsyncmov [#allocation2 + $0x1] }
  0xd5   :  { %s220_s26 = vpop.sfrf %219 }
  0xd6   :  { %p277_p11 = scmp.ne.s32.totalorder %s220_s26, 0 }
  0xd8   :  { %224 = shalt.err (%p277_p11)  }

</bundles_post_ra>
